<compile_context>
chip_gen: v7x
topology: tpu7x:2x2x1
jax: 0.10.0
libtpu: 0.0.40
codegen_flags: <defaults>
</compile_context>

<pallas_src>
import functools

import jax
import jax.numpy as jnp
from jax.experimental import pallas as pl
from jax.experimental.pallas import tpu as pltpu


def _round_up(x, m):
    return ((x + m - 1) // m) * m


def actor_kernel(x_ref, g_ref, w1_ref, w2_ref, w3_ref, b_ref,
                 action_ref, stats_ref, *, num_actions):
    """One row tile.

    x_ref  : (D,  TM) bf16  -- state, rows-on-lanes
    g_ref  : (Ap, TM) f32   -- precomputed Gumbel noise for this tile
    w*_ref : padded bf16 weights (VMEM-resident via constant index_maps)
    b_ref  : (Pb, 3)  f32   -- packed biases [b1 | b2 | b3]
    action_ref : (1, TM) i32
    stats_ref  : (2, TM) f32  -- row 0 = logprob, row 1 = entropy
    """
    Hp = w1_ref.shape[0]            # padded hidden dim
    Ap = w3_ref.shape[0]            # padded action dim
    TM = x_ref.shape[1]             # rows in this tile (lane axis)

    b1 = b_ref[0:Hp, 0:1]
    b2 = b_ref[0:Hp, 1:2]
    b3 = b_ref[0:Ap, 2:3]

    # --- MLP: Linear -> ReLU -> Linear -> ReLU -> Linear (bf16 MXU, f32 acc) --
    x = x_ref[...]                                                        # (D, TM) bf16
    h1 = jnp.dot(w1_ref[...], x, preferred_element_type=jnp.float32) + b1
    h1 = jnp.maximum(h1, 0.0).astype(jnp.bfloat16)
    h2 = jnp.dot(w2_ref[...], h1, preferred_element_type=jnp.float32) + b2
    h2 = jnp.maximum(h2, 0.0).astype(jnp.bfloat16)
    logits = jnp.dot(w3_ref[...], h2, preferred_element_type=jnp.float32) + b3  # (Ap, TM)

    # --- Mask padded action rows before any max / softmax / argmax -----------
    iota = jax.lax.broadcasted_iota(jnp.int32, (Ap, TM), 0).astype(jnp.float32)
    logits = jnp.where(iota < jnp.float32(num_actions), logits, jnp.float32(-1e30))

    # --- Categorical.sample() via Gumbel-max (first-max tie break) -----------
    z = logits + g_ref[...]
    zmax = jnp.max(z, axis=0, keepdims=True)
    action = jnp.min(jnp.where(z >= zmax, iota, jnp.float32(Ap)),
                     axis=0, keepdims=True)                               # (1, TM)

    # --- log-softmax / log_prob / entropy (matches torch Categorical) --------
    m = jnp.max(logits, axis=0, keepdims=True)
    s = logits - m
    e = jnp.exp(s)
    sum_e = jnp.sum(e, axis=0, keepdims=True)
    logp = s - jnp.log(sum_e)
    p = e / sum_e
    entropy = -jnp.sum(p * logp, axis=0, keepdims=True)                   # (1, TM)
    logprob = jnp.sum(jnp.where(iota == action, logp, 0.0),
                      axis=0, keepdims=True)                              # (1, TM)

    action_ref[...] = action.astype(jnp.int32)
    stats_ref[...] = jnp.concatenate([logprob, entropy], axis=0)


def make_params(key, state_dim, hidden_dim, action_space):
    """Params in PyTorch layout: W (out_features, in_features), b (out_features,).

    Mirrors init_layer: orthogonal weights (std sqrt(2); last layer std 1), zero bias.
    """
    k1, k2, k3 = jax.random.split(key, 3)
    ortho = jax.nn.initializers.orthogonal
    sqrt2 = float(jnp.sqrt(2.0))
    w1 = ortho(sqrt2)(k1, (hidden_dim, state_dim), jnp.float32)
    w2 = ortho(sqrt2)(k2, (hidden_dim, hidden_dim), jnp.float32)
    w3 = ortho(1.0)(k3, (action_space, hidden_dim), jnp.float32)
    b1 = jnp.zeros((hidden_dim,), jnp.float32)
    b2 = jnp.zeros((hidden_dim,), jnp.float32)
    b3 = jnp.zeros((action_space,), jnp.float32)
    return (w1, b1, w2, b2, w3, b3)


@jax.jit
def discrete_actor_forward(state, params, key):
    """state: (N, B, state_dim) f32 -> (action.T (B,N), logprob.sum(0) (B,), entropy.sum(0) (B,))."""
    # TODO(synk): only the `action is None` sampling path is implemented; the
    # provided-action evaluation path and the unused `action_mask` arg are not.
    w1, b1, w2, b2, w3, b3 = params
    N, B, D = state.shape
    H = w1.shape[0]
    A = w3.shape[0]
    R = N * B

    Hp = _round_up(H, 128)
    Ap = _round_up(A, 128)
    Pb = max(Hp, Ap)
    TM = 512 if R > 512 else _round_up(R, 128)
    R_pad = _round_up(R, TM)
    grid = (R_pad // TM,)

    # Pad + cast weights (lane-aligned, bf16); packed bias buffer (one tiny DMA).
    bf16 = jnp.bfloat16
    w1p = jnp.zeros((Hp, D), bf16).at[:H, :].set(w1.astype(bf16))
    w2p = jnp.zeros((Hp, Hp), bf16).at[:H, :H].set(w2.astype(bf16))
    w3p = jnp.zeros((Ap, Hp), bf16).at[:A, :H].set(w3.astype(bf16))
    b_all = (jnp.zeros((Pb, 3), jnp.float32)
             .at[:H, 0].set(b1).at[:H, 1].set(b2).at[:A, 2].set(b3))

    # Rows-on-lanes layout: (D, R_pad); zero-padded rows are sliced off below.
    x_t = jnp.zeros((D, R_pad), bf16).at[:, :R].set(
        state.reshape(R, D).T.astype(bf16))

    # Gumbel noise generated outside the kernel (portable to interpret mode;
    # the TPU hardware PRNG primitives have no CPU lowering).
    gumbel = jax.random.gumbel(key, (Ap, R_pad), jnp.float32)

    action_p, stats_p = pl.pallas_call(
        functools.partial(actor_kernel, num_actions=A),
        grid=grid,
        in_specs=[
            pl.BlockSpec((D, TM), lambda i: (0, i)),    # streamed state tile
            pl.BlockSpec((Ap, TM), lambda i: (0, i)),   # streamed Gumbel tile
            pl.BlockSpec((Hp, D), lambda i: (0, 0)),    # VMEM-resident weights
            pl.BlockSpec((Hp, Hp), lambda i: (0, 0)),
            pl.BlockSpec((Ap, Hp), lambda i: (0, 0)),
            pl.BlockSpec((Pb, 3), lambda i: (0, 0)),    # packed biases
        ],
        out_specs=(
            pl.BlockSpec((1, TM), lambda i: (0, i)),    # action (int32)
            pl.BlockSpec((2, TM), lambda i: (0, i)),    # [logprob; entropy]
        ),
        out_shape=(
            jax.ShapeDtypeStruct((1, R_pad), jnp.int32),
            jax.ShapeDtypeStruct((2, R_pad), jnp.float32),
        ),
        compiler_params=pltpu.CompilerParams(
            dimension_semantics=("parallel",)),
    )(x_t, gumbel, w1p, w2p, w3p, b_all)

    action = action_p[0, :R].reshape(N, B)
    logprob = stats_p[0, :R].reshape(N, B)
    entropy = stats_p[1, :R].reshape(N, B)
    # Matches: return (action.T, logprob.sum(0), entropy.sum(0))
    return action.T, logprob.sum(0), entropy.sum(0)


if __name__ == "__main__":
    # Small shapes: 3 agents, batch 4, state_dim 16, hidden 32, 8 discrete actions.
    N, B, STATE_DIM, HIDDEN_DIM, ACTION_SPACE = 3, 4, 16, 32, 8

    root = jax.random.PRNGKey(0)
    k_params, k_state, k_sample = jax.random.split(root, 3)

    params = make_params(k_params, STATE_DIM, HIDDEN_DIM, ACTION_SPACE)
    state = jax.random.normal(k_state, (N, B, STATE_DIM), jnp.float32)

    action_t, logprob_sum, entropy_sum = discrete_actor_forward(state, params, k_sample)
    jax.block_until_ready((action_t, logprob_sum, entropy_sum))

    assert action_t.shape == (B, N)
    assert logprob_sum.shape == (B,)
    assert entropy_sum.shape == (B,)
    assert bool(jnp.all((action_t >= 0) & (action_t < ACTION_SPACE)))
    assert bool(jnp.all(jnp.isfinite(logprob_sum)))
    assert bool(jnp.all(jnp.isfinite(entropy_sum)))
    print("KERNEL_OK")
</pallas_src>

<mosaic_0001>
module attributes {stable_mosaic.version = 11 : i64} {
  func.func @actor_kernel(%arg0: i32, %arg1: memref<16x128xbf16, #tpu.memory_space<vmem>>, %arg2: memref<128x128xf32, #tpu.memory_space<vmem>>, %arg3: memref<128x16xbf16, #tpu.memory_space<vmem>>, %arg4: memref<128x128xbf16, #tpu.memory_space<vmem>>, %arg5: memref<128x128xbf16, #tpu.memory_space<vmem>>, %arg6: memref<128x3xf32, #tpu.memory_space<vmem>>, %arg7: memref<1x128xi32, #tpu.memory_space<vmem>>, %arg8: memref<2x128xf32, #tpu.memory_space<vmem>>) attributes {dimension_semantics = [#tpu.dimension_semantics<parallel>], iteration_bounds = array<i64: 1>, scalar_prefetch = 0 : i64, scratch_operands = 0 : i64, tpu.core_type = #tpu.core_type<tc>, window_params = [{transform_indices = @transform_0, window_bounds = array<i64: 16, 128>}, {transform_indices = @transform_1, window_bounds = array<i64: 128, 128>}, {pipeline_mode = #tpu.pipeline_mode<synchronous>, transform_indices = @transform_2, window_bounds = array<i64: 128, 16>}, {pipeline_mode = #tpu.pipeline_mode<synchronous>, transform_indices = @transform_3, window_bounds = array<i64: 128, 128>}, {pipeline_mode = #tpu.pipeline_mode<synchronous>, transform_indices = @transform_4, window_bounds = array<i64: 128, 128>}, {pipeline_mode = #tpu.pipeline_mode<synchronous>, transform_indices = @transform_5, window_bounds = array<i64: 128, 3>}, {transform_indices = @transform_6, window_bounds = array<i64: 1, 128>}, {transform_indices = @transform_7, window_bounds = array<i64: 2, 128>}]} {
    %c0 = arith.constant 0 : index
    %c0_0 = arith.constant 0 : index
    %0 = vector.load %arg6[%c0, %c0_0] : memref<128x3xf32, #tpu.memory_space<vmem>>, vector<128x1xf32>
    %c0_1 = arith.constant 0 : index
    %c1 = arith.constant 1 : index
    %1 = vector.load %arg6[%c0_1, %c1] : memref<128x3xf32, #tpu.memory_space<vmem>>, vector<128x1xf32>
    %c0_2 = arith.constant 0 : index
    %c2 = arith.constant 2 : index
    %2 = vector.load %arg6[%c0_2, %c2] : memref<128x3xf32, #tpu.memory_space<vmem>>, vector<128x1xf32>
    %c0_3 = arith.constant 0 : index
    %c0_4 = arith.constant 0 : index
    %3 = vector.load %arg1[%c0_3, %c0_4] : memref<16x128xbf16, #tpu.memory_space<vmem>>, vector<16x128xbf16>
    %c0_5 = arith.constant 0 : index
    %c0_6 = arith.constant 0 : index
    %4 = vector.load %arg3[%c0_5, %c0_6] : memref<128x16xbf16, #tpu.memory_space<vmem>>, vector<128x16xbf16>
    %cst = arith.constant dense<0.000000e+00> : vector<128x128xf32>
    %5 = tpu.matmul %4, %3, %cst {dimension_numbers = #tpu.dot_dimension_numbers<[1], [0], [0], [1], [0, 0, 1, 1], [], []>} : vector<128x16xbf16>, vector<16x128xbf16>, vector<128x128xf32> -> vector<128x128xf32>
    %6 = vector.broadcast %0 : vector<128x1xf32> to vector<128x128xf32>
    %7 = arith.addf %5, %6 : vector<128x128xf32>
    %cst_7 = arith.constant 0.000000e+00 : f32
    %8 = vector.broadcast %cst_7 : f32 to vector<128x128xf32>
    %9 = arith.maximumf %7, %8 : vector<128x128xf32>
    %10 = arith.truncf %9 : vector<128x128xf32> to vector<128x128xbf16>
    %c0_8 = arith.constant 0 : index
    %c0_9 = arith.constant 0 : index
    %11 = vector.load %arg4[%c0_8, %c0_9] : memref<128x128xbf16, #tpu.memory_space<vmem>>, vector<128x128xbf16>
    %cst_10 = arith.constant dense<0.000000e+00> : vector<128x128xf32>
    %12 = tpu.matmul %11, %10, %cst_10 {dimension_numbers = #tpu.dot_dimension_numbers<[1], [0], [0], [1], [0, 0, 1, 1], [], []>} : vector<128x128xbf16>, vector<128x128xbf16>, vector<128x128xf32> -> vector<128x128xf32>
    %13 = vector.broadcast %1 : vector<128x1xf32> to vector<128x128xf32>
    %14 = arith.addf %12, %13 : vector<128x128xf32>
    %cst_11 = arith.constant 0.000000e+00 : f32
    %15 = vector.broadcast %cst_11 : f32 to vector<128x128xf32>
    %16 = arith.maximumf %14, %15 : vector<128x128xf32>
    %17 = arith.truncf %16 : vector<128x128xf32> to vector<128x128xbf16>
    %c0_12 = arith.constant 0 : index
    %c0_13 = arith.constant 0 : index
    %18 = vector.load %arg5[%c0_12, %c0_13] : memref<128x128xbf16, #tpu.memory_space<vmem>>, vector<128x128xbf16>
    %cst_14 = arith.constant dense<0.000000e+00> : vector<128x128xf32>
    %19 = tpu.matmul %18, %17, %cst_14 {dimension_numbers = #tpu.dot_dimension_numbers<[1], [0], [0], [1], [0, 0, 1, 1], [], []>} : vector<128x128xbf16>, vector<128x128xbf16>, vector<128x128xf32> -> vector<128x128xf32>
    %20 = vector.broadcast %2 : vector<128x1xf32> to vector<128x128xf32>
    %21 = arith.addf %19, %20 : vector<128x128xf32>
    %22 = tpu.iota {dimensions = array<i32: 0>} : vector<128x128xi32>
    %23 = arith.sitofp %22 : vector<128x128xi32> to vector<128x128xf32>
    %cst_15 = arith.constant 8.000000e+00 : f32
    %24 = vector.broadcast %cst_15 : f32 to vector<128x128xf32>
    %25 = arith.cmpf olt, %23, %24 : vector<128x128xf32>
    %cst_16 = arith.constant -1.000000e+30 : f32
    %26 = vector.broadcast %cst_16 : f32 to vector<128x128xf32>
    %27 = arith.select %25, %21, %26 : vector<128x128xi1>, vector<128x128xf32>
    %c0_17 = arith.constant 0 : index
    %c0_18 = arith.constant 0 : index
    %28 = vector.load %arg2[%c0_17, %c0_18] : memref<128x128xf32, #tpu.memory_space<vmem>>, vector<128x128xf32>
    %29 = arith.addf %27, %28 : vector<128x128xf32>
    %cst_19 = arith.constant dense<0xFF800000> : vector<128xf32>
    %30 = vector.multi_reduction <maximumf>, %29, %cst_19 [0] : vector<128x128xf32> to vector<128xf32>
    %31 = vector.shape_cast %30 : vector<128xf32> to vector<1x128xf32>
    %32 = vector.broadcast %31 : vector<1x128xf32> to vector<128x128xf32>
    %33 = arith.cmpf oge, %29, %32 : vector<128x128xf32>
    %cst_20 = arith.constant 1.280000e+02 : f32
    %34 = vector.broadcast %cst_20 : f32 to vector<128x128xf32>
    %35 = arith.select %33, %23, %34 : vector<128x128xi1>, vector<128x128xf32>
    %cst_21 = arith.constant dense<0x7F800000> : vector<128xf32>
    %36 = vector.multi_reduction <minimumf>, %35, %cst_21 [0] : vector<128x128xf32> to vector<128xf32>
    %37 = vector.shape_cast %36 : vector<128xf32> to vector<1x128xf32>
    %cst_22 = arith.constant dense<0xFF800000> : vector<128xf32>
    %38 = vector.multi_reduction <maximumf>, %27, %cst_22 [0] : vector<128x128xf32> to vector<128xf32>
    %39 = vector.shape_cast %38 : vector<128xf32> to vector<1x128xf32>
    %40 = vector.broadcast %39 : vector<1x128xf32> to vector<128x128xf32>
    %41 = arith.subf %27, %40 : vector<128x128xf32>
    %42 = math.exp %41 : vector<128x128xf32>
    %cst_23 = arith.constant dense<0.000000e+00> : vector<128xf32>
    %43 = vector.multi_reduction <add>, %42, %cst_23 [0] : vector<128x128xf32> to vector<128xf32>
    %44 = vector.shape_cast %43 : vector<128xf32> to vector<1x128xf32>
    %45 = math.log %44 : vector<1x128xf32>
    %46 = vector.broadcast %45 : vector<1x128xf32> to vector<128x128xf32>
    %47 = arith.subf %41, %46 : vector<128x128xf32>
    %48 = vector.broadcast %44 : vector<1x128xf32> to vector<128x128xf32>
    %49 = arith.divf %42, %48 : vector<128x128xf32>
    %50 = arith.mulf %49, %47 : vector<128x128xf32>
    %cst_24 = arith.constant dense<0.000000e+00> : vector<128xf32>
    %51 = vector.multi_reduction <add>, %50, %cst_24 [0] : vector<128x128xf32> to vector<128xf32>
    %52 = vector.shape_cast %51 : vector<128xf32> to vector<1x128xf32>
    %cst_25 = arith.constant 0.000000e+00 : f32
    %53 = vector.broadcast %cst_25 : f32 to vector<1x128xf32>
    %54 = arith.subf %53, %52 : vector<1x128xf32>
    %55 = vector.broadcast %37 : vector<1x128xf32> to vector<128x128xf32>
    %56 = arith.cmpf oeq, %23, %55 : vector<128x128xf32>
    %cst_26 = arith.constant 0.000000e+00 : f32
    %57 = vector.broadcast %cst_26 : f32 to vector<128x128xf32>
    %58 = arith.select %56, %47, %57 : vector<128x128xi1>, vector<128x128xf32>
    %cst_27 = arith.constant dense<0.000000e+00> : vector<128xf32>
    %59 = vector.multi_reduction <add>, %58, %cst_27 [0] : vector<128x128xf32> to vector<128xf32>
    %60 = vector.shape_cast %59 : vector<128xf32> to vector<1x128xf32>
    %61 = arith.fptosi %37 : vector<1x128xf32> to vector<1x128xi32>
    %c0_28 = arith.constant 0 : index
    %c0_29 = arith.constant 0 : index
    %62 = vector.load %arg7[%c0_28, %c0_29] : memref<1x128xi32, #tpu.memory_space<vmem>>, vector<1x128xi32>
    tpu.vector_store %arg7[%c0_28, %c0_29], %61 {strides = array<i32>} : memref<1x128xi32, #tpu.memory_space<vmem>>, vector<1x128xi32>,
    %63 = tpu.concatenate %60, %54 in 0 : vector<1x128xf32>, vector<1x128xf32> -> vector<2x128xf32>
    %c0_30 = arith.constant 0 : index
    %c0_31 = arith.constant 0 : index
    %64 = vector.load %arg8[%c0_30, %c0_31] : memref<2x128xf32, #tpu.memory_space<vmem>>, vector<2x128xf32>
    tpu.vector_store %arg8[%c0_30, %c0_31], %63 {strides = array<i32>} : memref<2x128xf32, #tpu.memory_space<vmem>>, vector<2x128xf32>,
    return
  }
  func.func @transform_0(%arg0: i32) -> (i32, i32) {
    %c0_i32 = arith.constant 0 : i32
    %c0_i32_0 = arith.constant 0 : i32
    return %c0_i32, %arg0 : i32, i32
  }
  func.func @transform_1(%arg0: i32) -> (i32, i32) {
    %c0_i32 = arith.constant 0 : i32
    %c0_i32_0 = arith.constant 0 : i32
    return %c0_i32, %arg0 : i32, i32
  }
  func.func @transform_2(%arg0: i32) -> (i32, i32) {
    %c0_i32 = arith.constant 0 : i32
    %c0_i32_0 = arith.constant 0 : i32
    %c0_i32_1 = arith.constant 0 : i32
    return %c0_i32, %c0_i32_0 : i32, i32
  }
  func.func @transform_3(%arg0: i32) -> (i32, i32) {
    %c0_i32 = arith.constant 0 : i32
    %c0_i32_0 = arith.constant 0 : i32
    %c0_i32_1 = arith.constant 0 : i32
    return %c0_i32, %c0_i32_0 : i32, i32
  }
  func.func @transform_4(%arg0: i32) -> (i32, i32) {
    %c0_i32 = arith.constant 0 : i32
    %c0_i32_0 = arith.constant 0 : i32
    %c0_i32_1 = arith.constant 0 : i32
    return %c0_i32, %c0_i32_0 : i32, i32
  }
  func.func @transform_5(%arg0: i32) -> (i32, i32) {
    %c0_i32 = arith.constant 0 : i32
    %c0_i32_0 = arith.constant 0 : i32
    %c0_i32_1 = arith.constant 0 : i32
    return %c0_i32, %c0_i32_0 : i32, i32
  }
  func.func @transform_6(%arg0: i32) -> (i32, i32) {
    %c0_i32 = arith.constant 0 : i32
    %c0_i32_0 = arith.constant 0 : i32
    return %c0_i32, %arg0 : i32, i32
  }
  func.func @transform_7(%arg0: i32) -> (i32, i32) {
    %c0_i32 = arith.constant 0 : i32
    %c0_i32_0 = arith.constant 0 : i32
    return %c0_i32, %arg0 : i32, i32
  }
}

</mosaic_0001>

<bundles_post_ra>
// kernel: squeeze.8
= control target key start
LH: loop header
LB: loop body
LE: loop exit
PB: predicated region body
PF: predicated region fallthrough
CT: control target
= control target key end

     0   :  { %vm7_vm0 = vcmask 31744   ;;  %s30_s8 = smov 120   ;;  %s47_s0 = inlined_call_operand.vmem [shape: f32[12], index: 0, kind: input, shape index: {}]   ;;  %s48_s1 = inlined_call_operand.vmem [shape: f32[3,4], index: 1, kind: output, shape index: {}]  }
   0x1   :  { %v4_v0 = vld [vmem:[%s47_s0] sm:$0x1]  ;;  %s29_s0 = smov 124  }
   0x2   :  { %5 = vst [vmem:[#allocation1] sm:$0x1] %v4_v0 }
   0x9   :  { %v9_v1 = vld [vmem:[#allocation1] sm:$0x1]  }
   0xa   :  { %v6_v2 = vld [vmem:[#allocation1] sm:$0x1]   ;;  %10 = vrot.lane.b32.xlu0 %v9_v1, %s29_s0 }
   0xb   :  { %8 = vst.msk [vmem:[#allocation0] sm:$0x1] %vm7_vm0, %v6_v2   ;;  %v15_v3 = vld [vmem:[#allocation1] sm:$0x1]  }
   0xe   :  { %16 = vrot.lane.b32.xlu0 %v15_v3, %s30_s8 }
  0x7c   :  { %v11_v4 = vpop.permute.xlu0 %10  }
  0x7d   :  { %14 = vst.msk [vmem:[#allocation0 + $0x1] sm:$0x1] %vm7_vm0, %v11_v4  }
  0x80   :  { %v17_v5 = vpop.permute.xlu0 %16  }
  0x81   :  { %20 = vst.msk [vmem:[#allocation0 + $0x2] sm:$0x1] %vm7_vm0, %v17_v5  }
  0x88   :  { %v24_v6 = vld [vmem:[#allocation0] sm:$0xf] }
  0x89   :  { %26 = vst [vmem:[%s48_s1] sm:$0xf] %v24_v6 }

// kernel: squeeze.7
= control target key start
LH: loop header
LB: loop body
LE: loop exit
PB: predicated region body
PF: predicated region fallthrough
CT: control target
= control target key end

     0   :  { %vm7_vm0 = vcmask 31744   ;;  %s30_s8 = smov 120   ;;  %s47_s0 = inlined_call_operand.vmem [shape: s32[12], index: 0, kind: input, shape index: {}]   ;;  %s48_s1 = inlined_call_operand.vmem [shape: s32[3,4], index: 1, kind: output, shape index: {}]  }
   0x1   :  { %v4_v0 = vld [vmem:[%s47_s0] sm:$0x1]  ;;  %s29_s0 = smov 124  }
   0x2   :  { %5 = vst [vmem:[#allocation1] sm:$0x1] %v4_v0 }
   0x9   :  { %v9_v1 = vld [vmem:[#allocation1] sm:$0x1]  }
   0xa   :  { %v6_v2 = vld [vmem:[#allocation1] sm:$0x1]   ;;  %10 = vrot.lane.b32.xlu0 %v9_v1, %s29_s0 }
   0xb   :  { %8 = vst.msk [vmem:[#allocation0] sm:$0x1] %vm7_vm0, %v6_v2   ;;  %v15_v3 = vld [vmem:[#allocation1] sm:$0x1]  }
   0xe   :  { %16 = vrot.lane.b32.xlu0 %v15_v3, %s30_s8 }
  0x7c   :  { %v11_v4 = vpop.permute.xlu0 %10  }
  0x7d   :  { %14 = vst.msk [vmem:[#allocation0 + $0x1] sm:$0x1] %vm7_vm0, %v11_v4  }
  0x80   :  { %v17_v5 = vpop.permute.xlu0 %16  }
  0x81   :  { %20 = vst.msk [vmem:[#allocation0 + $0x2] sm:$0x1] %vm7_vm0, %v17_v5  }
  0x88   :  { %v24_v6 = vld [vmem:[#allocation0] sm:$0xf] }
  0x89   :  { %26 = vst [vmem:[%s48_s1] sm:$0xf] %v24_v6 }

// kernel: discrete_actor_forward.1
= control target key start
LH: loop header
LB: loop body
LE: loop exit
PB: predicated region body
PF: predicated region fallthrough
CT: control target
= control target key end

     0   :  { %vm186_vm0 = vcmask 130048   ;;  %v1434_v1 = vmov 0   ;;  %v1435_v27 = vmov 1   ;;  %s2223_s0 = inlined_call_operand.vmem [shape: bf16[16,128], index: 0, kind: input, shape index: {}]   ;;  %s2224_s2 = inlined_call_operand.vmem [shape: bf16[128,16], index: 2, kind: input, shape index: {}]   ;;  %s2225_s5 = inlined_call_operand.vmem [shape: f32[128,3], index: 5, kind: input, shape index: {}]   ;;  %s2226_s3 = inlined_call_operand.vmem [shape: bf16[128,128], index: 3, kind: input, shape index: {}]   ;;  %s2227_s4 = inlined_call_operand.vmem [shape: bf16[128,128], index: 4, kind: input, shape index: {}]   ;;  %s2228_s1 = inlined_call_operand.vmem [shape: f32[128,128], index: 1, kind: input, shape index: {}]   ;;  %s2229_s6 = inlined_call_operand.vmem [shape: s32[1,128], index: 6, kind: output, shape index: {0}]   ;;  %s2230_s7 = inlined_call_operand.vmem [shape: f32[2,128], index: 7, kind: output, shape index: {1}]  }
   0x1   :  { %v1373_v0 = vld [vmem:[%s2223_s0] sm:$0xff]   ;;  %1367 = vset.pattern.permute.xlu0 %v1434_v1  ;;  %1368 = vset.pattern.permute.xlu1 %v1434_v1  ;;  %v1375_v3 = vld [vmem:[%s2224_s2 + $0x8] sm:$0xff]   ;;  %v1376_v4 = vld [vmem:[%s2224_s2 + $0x10] sm:$0xff]  }
   0x2   :  { %v1374_v2 = vld [vmem:[%s2224_s2] sm:$0xff]   ;;  %1280 = vmatprep.subr.bf16.mxu0 %v1373_v0  ;;  %v1500_v6 = vld [vmem:[%s2225_s5 + $0x10] sm:$0xff]  ;;  %v1377_v7 = vld [vmem:[%s2224_s2 + $0x18] sm:$0xff]  }
   0x3   :  { %1281 = vmatpush3.bf16.msra.mxu0 %v1373_v0  ;;  %1282 = vmatprep.mubr.msk.bf16.mxu0 %vm186_vm0, %v1374_v2  ;;  %v1495_v5 = vld [vmem:[%s2225_s5] sm:$0xff]  ;;  %v1513_v9 = vld [vmem:[%s2225_s5 + $0x8] sm:$0xff]  ;;  %v1518_v10 = vld [vmem:[%s2225_s5 + $0x18] sm:$0xff] }
   0x4   :  { %62 = vperm.xlu0 %1367, %v1495_v5   ;;  %72 = vperm.xlu1 %1368, %v1500_v6   ;;  %v1378_v8 = vld [vmem:[%s2224_s2 + $0x20] sm:$0xff]   ;;  %v1532_v12 = vld [vmem:[%s2225_s5 + $0x28] sm:$0xff]  ;;  %v1380_v14 = vld [vmem:[%s2224_s2 + $0x30] sm:$0xff]  }
   0x5   :  { %v1527_v11 = vld [vmem:[%s2225_s5 + $0x20] sm:$0xff]  ;;  %v1379_v13 = vld [vmem:[%s2224_s2 + $0x28] sm:$0xff]   ;;  %v1545_v15 = vld [vmem:[%s2225_s5 + $0x30] sm:$0xff] }
   0x6   :  { %1283 = vmatmul.mubr.msk.bf16.vlgmr.msra.gmra.mrb[0].mxu0 %vm186_vm0, %v1375_v3  ;;  %v1550_v16 = vld [vmem:[%s2225_s5 + $0x38] sm:$0xff]  ;;  %v1559_v17 = vld [vmem:[%s2225_s5 + $0x40] sm:$0xff]  ;;  %v1564_v18 = vld [vmem:[%s2225_s5 + $0x48] sm:$0xff] }
   0x7   :  { %1286 = vmatprep.mubr.msk.bf16.mxu0 %vm186_vm0, %v1376_v4  ;;  %v1381_v19 = vld [vmem:[%s2224_s2 + $0x38] sm:$0xff]   ;;  %v1574_v20 = vld [vmem:[%s2225_s5 + $0x50] sm:$0xff]  ;;  %v1587_v22 = vld [vmem:[%s2225_s5 + $0x60] sm:$0xff] }
   0x8   :  { %67 = vperm.xlu0 %1367, %v1513_v9   ;;  %77 = vperm.xlu1 %1368, %v1518_v10   ;;  %v1579_v21 = vld [vmem:[%s2225_s5 + $0x58] sm:$0xff]  ;;  %v1592_v23 = vld [vmem:[%s2225_s5 + $0x68] sm:$0xff]  ;;  %v1599_v24 = vld [vmem:[%s2225_s5 + $0x70] sm:$0xff] }
   0x9   :  { %v1604_v25 = vld [vmem:[%s2225_s5 + $0x78] sm:$0xff]  ;;  %v1382_v26 = vld [vmem:[%s2226_s3] sm:$0xff]  }
   0xa   :  { %1314 = vmatprep.mubr.bf16.mxu1 %v1382_v26 }
   0xc   :  { %82 = vperm.xlu0 %1367, %v1527_v11   ;;  %87 = vperm.xlu1 %1368, %v1532_v12  }
   0xe   :  { %1287 = vmatmul.mubr.msk.bf16.gmra.mrb[4].mxu0 %vm186_vm0, %v1377_v7 }
   0xf   :  { %1290 = vmatprep.mubr.msk.bf16.mxu0 %vm186_vm0, %v1378_v8 }
  0x10   :  { %92 = vperm.xlu0 %1367, %v1545_v15   ;;  %97 = vperm.xlu1 %1368, %v1550_v16  }
  0x14   :  { %102 = vperm.xlu0 %1367, %v1559_v17   ;;  %107 = vperm.xlu1 %1368, %v1564_v18  }
  0x16   :  { %1291 = vmatmul.mubr.msk.bf16.gmra.mrb[8].mxu0 %vm186_vm0, %v1379_v13 }
  0x17   :  { %1294 = vmatprep.mubr.msk.bf16.mxu0 %vm186_vm0, %v1380_v14 }
  0x18   :  { %112 = vperm.xlu0 %1367, %v1574_v20   ;;  %117 = vperm.xlu1 %1368, %v1579_v21  }
  0x1c   :  { %122 = vperm.xlu0 %1367, %v1587_v22   ;;  %127 = vperm.xlu1 %1368, %v1592_v23  }
  0x1e   :  { %1295 = vmatmul.mubr.msk.bf16.gmra.mrb[12].mxu0 %vm186_vm0, %v1381_v19 }
  0x20   :  { %132 = vperm.xlu0 %1367, %v1599_v24   ;;  %137 = vperm.xlu1 %1368, %v1604_v25  }
  0x24   :  { %1370 = vset.pattern.permute.xlu1 %v1435_v27  ;;  %1369 = vset.pattern.permute.xlu0 %v1435_v27 }
  0x25   :  { %353 = vperm.xlu1 %1370, %v1513_v9   ;;  %349 = vperm.xlu0 %1369, %v1495_v5  }
  0x29   :  { %357 = vperm.xlu1 %1370, %v1500_v6   ;;  %361 = vperm.xlu0 %1369, %v1518_v10  }
  0x2d   :  { %365 = vperm.xlu1 %1370, %v1527_v11   ;;  %369 = vperm.xlu0 %1369, %v1532_v12  }
  0x31   :  { %373 = vperm.xlu1 %1370, %v1545_v15   ;;  %377 = vperm.xlu0 %1369, %v1550_v16  }
  0x35   :  { %381 = vperm.xlu1 %1370, %v1559_v17   ;;  %385 = vperm.xlu0 %1369, %v1564_v18  }
  0x39   :  { %389 = vperm.xlu1 %1370, %v1574_v20   ;;  %393 = vperm.xlu0 %1369, %v1579_v21  }
  0x3d   :  { %397 = vperm.xlu1 %1370, %v1587_v22   ;;  %401 = vperm.xlu0 %1369, %v1592_v23  }
  0x41   :  { %405 = vperm.xlu1 %1370, %v1599_v24   ;;  %409 = vperm.xlu0 %1369, %v1604_v25  }
  0x83   :  { %v63_v28 = vpop.permute.xlu0 %62  ;;  %v73_v29 = vpop.permute.xlu1 %72 }
  0x87   :  { %v68_v30 = vpop.permute.xlu0 %67  ;;  %v78_v31 = vpop.permute.xlu1 %77 }
  0x8b   :  { %v83_v32 = vpop.permute.xlu0 %82  ;;  %v88_v33 = vpop.permute.xlu1 %87 }
  0x8f   :  { %v93_v34 = vpop.permute.xlu0 %92  ;;  %v98_v38 = vpop.permute.xlu1 %97 }
  0x93   :  { %v103_v46 = vpop.permute.xlu0 %102  ;;  %v108_v50 = vpop.permute.xlu1 %107 }
  0x97   :  { %v113_v59 = vpop.permute.xlu0 %112  ;;  %v118_v63 = vpop.permute.xlu1 %117 }
  0x9b   :  { %v123_v13 = vpop.permute.xlu0 %122 }
  0xd9   :  { %v1284_v35 = vpop.f32.mrb[0].mxu0 }
  0xda   :  { %v254_v36 = vadd.f32 %v1284_v35, %v73_v29  ;;  %v245_v37 = vpop.f32.mrb[1].mxu0  ;;  %v133_v35 = vpop.permute.xlu0 %132 }
  0xdb   :  { %v246_v39 = vadd.f32 %v245_v37, %v63_v28  ;;  %v1285_v40 = vpop.f32.mrb[2].mxu0  ;;  %v128_v28 = vpop.permute.xlu1 %127 }
  0xdc   :  { %v257_v41 = vadd.f32 %v1285_v40, %v78_v31  ;;  %v248_v42 = vpop.f32.mrb[3].mxu0  ;;  %v310_v44 = vmax.f32 %v254_v36, 0.0 }
  0xdd   :  { %v249_v43 = vadd.f32 %v248_v42, %v68_v30  ;;  %v308_v47 = vmax.f32 %v246_v39, 0.0 }
  0xde   :  { %v311_v45 = vmax.f32 %v257_v41, 0.0 }
  0xdf   :  { %v309_v48 = vmax.f32 %v249_v43, 0.0  ;;  %v138_v40 = vpop.permute.xlu1 %137 }
  0xe0   :  { %v325_v49 = vpack.c.bf16 %v311_v45, %v310_v44 }
  0xe1   :  { %v1288_v51 = vpop.f32.mrb[4].mxu0  ;;  %v324_v52 = vpack.c.bf16 %v309_v48, %v308_v47 }
  0xe2   :  { %v270_v53 = vadd.f32 %v1288_v51, %v93_v34  ;;  %v261_v54 = vpop.f32.mrb[5].mxu0 }
  0xe3   :  { %v262_v55 = vadd.f32 %v261_v54, %v83_v32  ;;  %v1289_v56 = vpop.f32.mrb[6].mxu0  ;;  %1298 = vmatprep.subr.bf16.mxu1 %v324_v52  ;;  %v1385_v54 = vld [vmem:[%s2226_s3 + $0x18] sm:$0xff]  }
  0xe4   :  { %v273_v57 = vadd.f32 %v1289_v56, %v98_v38  ;;  %v264_v58 = vpop.f32.mrb[7].mxu0  ;;  %1299 = vmatpush3.bf16.msra.mxu1 %v324_v52  ;;  %v314_v61 = vmax.f32 %v270_v53, 0.0  ;;  %v1383_v52 = vld [vmem:[%s2226_s3 + $0x8] sm:$0xff]   ;;  %v1384_v53 = vld [vmem:[%s2226_s3 + $0x10] sm:$0xff]  }
  0xe5   :  { %v265_v60 = vadd.f32 %v264_v58, %v88_v33  ;;  %1300 = vmatprep.subr.bf16.mxu1 %v325_v49  ;;  %v312_v0 = vmax.f32 %v262_v55, 0.0  ;;  %v1386_v55 = vld [vmem:[%s2226_s3 + $0x20] sm:$0xff]   ;;  %v1387_v56 = vld [vmem:[%s2226_s3 + $0x28] sm:$0xff]   ;;  %v1389_v58 = vld [vmem:[%s2226_s3 + $0x38] sm:$0xff]  }
  0xe6   :  { %v315_v62 = vmax.f32 %v273_v57, 0.0  ;;  %v1388_v57 = vld [vmem:[%s2226_s3 + $0x30] sm:$0xff]  }
  0xe7   :  { %v313_v1 = vmax.f32 %v265_v60, 0.0  ;;  %v1436_v60 = vmov 2  }
  0xe8   :  { %v327_v2 = vpack.c.bf16 %v315_v62, %v314_v61  ;;  %1301 = vmatpush3.bf16.msra.mxu1 %v325_v49  ;;  %1371 = vset.pattern.permute.xlu1 %v1436_v60 }
  0xe9   :  { %v326_v3 = vpack.c.bf16 %v313_v1, %v312_v0  ;;  %v1292_v4 = vpop.f32.mrb[8].mxu0  ;;  %1372 = vset.pattern.permute.xlu0 %v1436_v60  ;;  %598 = vperm.xlu1 %1371, %v1495_v5   ;;  %v354_v5 = vpop.permute.xlu1 %353 }
  0xea   :  { %v286_v7 = vadd.f32 %v1292_v4, %v113_v59  ;;  %v277_v8 = vpop.f32.mrb[9].mxu0  ;;  %v1390_v59 = vld [vmem:[%s2227_s4] sm:$0xff]   ;;  %602 = vperm.xlu0 %1372, %v1513_v9  }
  0xeb   :  { %v278_v14 = vadd.f32 %v277_v8, %v103_v46  ;;  %v1293_v19 = vpop.f32.mrb[10].mxu0  ;;  %1302 = vmatprep.subr.bf16.mxu1 %v326_v3  ;;  %1346 = vmatprep.mubr.bf16.mxu0 %v1390_v59 }
  0xec   :  { %v289_v26 = vadd.f32 %v1293_v19, %v118_v63  ;;  %v280_v27 = vpop.f32.mrb[11].mxu0  ;;  %1303 = vmatpush3.bf16.msra.mxu1 %v326_v3  ;;  %v318_v30 = vmax.f32 %v286_v7, 0.0 }
  0xed   :  { %v281_v29 = vadd.f32 %v280_v27, %v108_v50  ;;  %1304 = vmatprep.subr.bf16.mxu1 %v327_v2  ;;  %v316_v32 = vmax.f32 %v278_v14, 0.0  ;;  %606 = vperm.xlu1 %1371, %v1500_v6   ;;  %v350_v6 = vpop.permute.xlu0 %349  ;;  %v358_v9 = vpop.permute.xlu1 %357 }
  0xee   :  { %v319_v31 = vmax.f32 %v289_v26, 0.0  ;;  %614 = vperm.xlu0 %1372, %v1527_v11  }
  0xef   :  { %v317_v33 = vmax.f32 %v281_v29, 0.0 }
  0xf0   :  { %v329_v34 = vpack.c.bf16 %v319_v31, %v318_v30  ;;  %1305 = vmatpush3.bf16.msra.mxu1 %v327_v2 }
  0xf1   :  { %v328_v36 = vpack.c.bf16 %v317_v33, %v316_v32  ;;  %v1296_v37 = vpop.f32.mrb[12].mxu0  ;;  %610 = vperm.xlu1 %1371, %v1518_v10   ;;  %v362_v10 = vpop.permute.xlu0 %361 }
  0xf2   :  { %v302_v38 = vadd.f32 %v1296_v37, %v133_v35  ;;  %v293_v39 = vpop.f32.mrb[13].mxu0  ;;  %622 = vperm.xlu0 %1372, %v1545_v15   ;;  %v366_v11 = vpop.permute.xlu1 %365 }
  0xf3   :  { %v294_v41 = vadd.f32 %v293_v39, %v123_v13  ;;  %v1297_v42 = vpop.f32.mrb[14].mxu0  ;;  %1306 = vmatprep.subr.bf16.mxu1 %v328_v36 }
  0xf4   :  { %v305_v43 = vadd.f32 %v1297_v42, %v138_v40  ;;  %v296_v44 = vpop.f32.mrb[15].mxu0  ;;  %1307 = vmatpush3.bf16.msra.mxu1 %v328_v36  ;;  %v322_v46 = vmax.f32 %v302_v38, 0.0 }
  0xf5   :  { %v297_v45 = vadd.f32 %v296_v44, %v128_v28  ;;  %1308 = vmatprep.subr.bf16.mxu1 %v329_v34  ;;  %v320_v48 = vmax.f32 %v294_v41, 0.0  ;;  %618 = vperm.xlu1 %1371, %v1532_v12   ;;  %v370_v12 = vpop.permute.xlu0 %369 }
  0xf6   :  { %v323_v47 = vmax.f32 %v305_v43, 0.0  ;;  %630 = vperm.xlu0 %1372, %v1559_v17   ;;  %v374_v15 = vpop.permute.xlu1 %373 }
  0xf7   :  { %v321_v49 = vmax.f32 %v297_v45, 0.0 }
  0xf8   :  { %v331_v50 = vpack.c.bf16 %v323_v47, %v322_v46  ;;  %1309 = vmatpush3.bf16.msra.mxu1 %v329_v34 }
  0xf9   :  { %v330_v51 = vpack.c.bf16 %v321_v49, %v320_v48  ;;  %626 = vperm.xlu1 %1371, %v1550_v16  }
  0xfa   :  { %638 = vperm.xlu0 %1372, %v1574_v20   ;;  %v378_v20 = vpop.permute.xlu0 %377  ;;  %v382_v0 = vpop.permute.xlu1 %381 }
  0xfb   :  { %1310 = vmatprep.subr.bf16.mxu1 %v330_v51 }
  0xfc   :  { %1311 = vmatpush3.bf16.msra.mxu1 %v330_v51 }
  0xfd   :  { %1312 = vmatprep.subr.bf16.mxu1 %v331_v50  ;;  %634 = vperm.xlu1 %1371, %v1564_v18  }
  0xfe   :  { %646 = vperm.xlu0 %1372, %v1587_v22   ;;  %v386_v3 = vpop.permute.xlu0 %385  ;;  %v390_v28 = vpop.permute.xlu1 %389 }
 0x100   :  { %1313 = vmatpush3.bf16.msra.mxu1 %v331_v50 }
 0x101   :  { %642 = vperm.xlu1 %1371, %v1579_v21  }
 0x102   :  { %654 = vperm.xlu0 %1372, %v1599_v24   ;;  %v394_v32 = vpop.permute.xlu0 %393  ;;  %v398_v40 = vpop.permute.xlu1 %397 }
 0x103   :  { %1315 = vmatmul.mubr.bf16.vlgmr.msra.gmra.mrb[0].mxu1 %v1383_v52 }
 0x104   :  { %1318 = vmatprep.mubr.bf16.mxu1 %v1384_v53 }
 0x105   :  { %650 = vperm.xlu1 %1371, %v1592_v23  }
 0x106   :  { %v402_v45 = vpop.permute.xlu0 %401  ;;  %v406_v52 = vpop.permute.xlu1 %405 }
 0x109   :  { %658 = vperm.xlu1 %1371, %v1604_v25  }
 0x10b   :  { %1319 = vmatmul.mubr.bf16.gmra.mrb[4].mxu1 %v1385_v54 }
 0x10c   :  { %1322 = vmatprep.mubr.bf16.mxu1 %v1386_v55 }
 0x113   :  { %1323 = vmatmul.mubr.bf16.gmra.mrb[8].mxu1 %v1387_v56 }
 0x114   :  { %1326 = vmatprep.mubr.bf16.mxu1 %v1388_v57  ;;  %v410_v57 = vpop.permute.xlu0 %409 }
 0x11b   :  { %1327 = vmatmul.mubr.bf16.gmra.mrb[12].mxu1 %v1389_v58 }
 0x1d6   :  { %v1316_v16 = vpop.f32.mrb[0].mxu1 }
 0x1d7   :  { %v503_v17 = vadd.f32 %v1316_v16, %v358_v9  ;;  %v494_v18 = vpop.f32.mrb[1].mxu1 }
 0x1d8   :  { %v495_v22 = vadd.f32 %v494_v18, %v350_v6  ;;  %v1317_v61 = vpop.f32.mrb[2].mxu1  ;;  %v1392_v18 = vld [vmem:[%s2227_s4 + $0x10] sm:$0xff]  }
 0x1d9   :  { %v506_v21 = vadd.f32 %v1317_v61, %v362_v10  ;;  %v497_v62 = vpop.f32.mrb[3].mxu1  ;;  %v559_v63 = vmax.f32 %v503_v17, 0.0  ;;  %v1391_v17 = vld [vmem:[%s2227_s4 + $0x8] sm:$0xff]  }
 0x1da   :  { %v498_v24 = vadd.f32 %v497_v62, %v354_v5  ;;  %v557_v25 = vmax.f32 %v495_v22, 0.0  ;;  %v1394_v22 = vld [vmem:[%s2227_s4 + $0x20] sm:$0xff]   ;;  %v1395_v61 = vld [vmem:[%s2227_s4 + $0x28] sm:$0xff]   ;;  %v1397_v62 = vld [vmem:[%s2227_s4 + $0x38] sm:$0xff]  }
 0x1db   :  { %v560_v23 = vmax.f32 %v506_v21, 0.0  ;;  %v1396_v21 = vld [vmem:[%s2227_s4 + $0x30] sm:$0xff]  }
 0x1dc   :  { %v558_v1 = vmax.f32 %v498_v24, 0.0  ;;  %v599_v24 = vpop.permute.xlu1 %598 }
 0x1dd   :  { %v574_v2 = vpack.c.bf16 %v560_v23, %v559_v63  ;;  %v806_v23 = vlaneseq }
 0x1de   :  { %v573_v4 = vpack.c.bf16 %v558_v1, %v557_v25  ;;  %v1320_v7 = vpop.f32.mrb[4].mxu1 }
 0x1df   :  { %v519_v8 = vadd.f32 %v1320_v7, %v374_v15  ;;  %v510_v13 = vpop.f32.mrb[5].mxu1  ;;  %v1688_v1 = vshrl.u32 %v806_v23, 7  ;;  %v872_v23 = vld [vmem:[%s2228_s1 + $0x8] sm:$0xff] }
 0x1e0   :  { %v511_v14 = vadd.f32 %v510_v13, %v366_v11  ;;  %v1321_v19 = vpop.f32.mrb[6].mxu1  ;;  %1330 = vmatprep.subr.bf16.mxu0 %v573_v4  ;;  %v607_v63 = vpop.permute.xlu1 %606 }
 0x1e1   :  { %v522_v26 = vadd.f32 %v1321_v19, %v378_v20  ;;  %v513_v27 = vpop.f32.mrb[7].mxu1  ;;  %1331 = vmatpush3.bf16.msra.mxu0 %v573_v4  ;;  %v563_v30 = vmax.f32 %v519_v8, 0.0  ;;  %v1393_v20 = vld [vmem:[%s2227_s4 + $0x18] sm:$0xff]   ;;  %v810_v7 = vadd.s32 24, %v1688_v1  ;;  %v808_v8 = vadd.s32 8, %v1688_v1 }
 0x1e2   :  { %v514_v29 = vadd.f32 %v513_v27, %v370_v12  ;;  %1332 = vmatprep.subr.bf16.mxu0 %v574_v2  ;;  %v561_v33 = vmax.f32 %v511_v14, 0.0  ;;  %v813_v13 = vadd.s32 48, %v1688_v1  ;;  %v811_v19 = vadd.s32 32, %v1688_v1 }
 0x1e3   :  { %v564_v31 = vmax.f32 %v522_v26, 0.0  ;;  %v814_v26 = vadd.s32 56, %v1688_v1 }
 0x1e4   :  { %v562_v34 = vmax.f32 %v514_v29, 0.0  ;;  %v611_v25 = vpop.permute.xlu1 %610  ;;  %v812_v29 = vadd.s32 40, %v1688_v1 }
 0x1e5   :  { %v576_v35 = vpack.c.bf16 %v564_v31, %v563_v30  ;;  %1333 = vmatpush3.bf16.msra.mxu0 %v574_v2  ;;  %v1702_v31 = vcvt.s32.f32 %v1688_v1 }
 0x1e6   :  { %v575_v36 = vpack.c.bf16 %v562_v34, %v561_v33  ;;  %v1324_v37 = vpop.f32.mrb[8].mxu1  ;;  %v1704_v34 = vcvt.s32.f32 %v810_v7  ;;  %v876_v7 = vld [vmem:[%s2228_s1 + $0x28] sm:$0xff] }
 0x1e7   :  { %v535_v38 = vadd.f32 %v1324_v37, %v390_v28  ;;  %v526_v39 = vpop.f32.mrb[9].mxu1  ;;  %vm839_vm2 = vcmp.lt.f32.partialorder %v1702_v31, 8.0 }
 0x1e8   :  { %v527_v41 = vadd.f32 %v526_v39, %v382_v0  ;;  %v1325_v42 = vpop.f32.mrb[10].mxu1  ;;  %1334 = vmatprep.subr.bf16.mxu0 %v575_v36  ;;  %v603_v0 = vpop.permute.xlu0 %602  ;;  %v1711_v39 = vcvt.s32.f32 %v811_v19  ;;  %vm842_vm3 = vcmp.lt.f32.partialorder %v1704_v34, 8.0 }
 0x1e9   :  { %v538_v43 = vadd.f32 %v1325_v42, %v394_v32  ;;  %v529_v44 = vpop.f32.mrb[11].mxu1  ;;  %1335 = vmatpush3.bf16.msra.mxu0 %v575_v36  ;;  %v567_v47 = vmax.f32 %v535_v38, 0.0  ;;  %v1691_v4 = vpop.permute.xlu1 %618  ;;  %v1708_v36 = vcvt.s32.f32 %v813_v13  ;;  %v1715_v42 = vcvt.s32.f32 %v812_v29 }
 0x1ea   :  { %v530_v46 = vadd.f32 %v529_v44, %v386_v3  ;;  %1336 = vmatprep.subr.bf16.mxu0 %v576_v35  ;;  %v565_v49 = vmax.f32 %v527_v41, 0.0  ;;  %v809_v3 = vadd.s32 16, %v1688_v1  ;;  %v815_v44 = vadd.s32 64, %v1688_v1 }
 0x1eb   :  { %v568_v48 = vmax.f32 %v538_v43, 0.0  ;;  %v817_v43 = vadd.s32 80, %v1688_v1  ;;  %vm845_vm5 = vcmp.lt.f32.partialorder %v1708_v36, 8.0  ;;  %vm843_vm6 = vcmp.lt.f32.partialorder %v1711_v39, 8.0 }
 0x1ec   :  { %v566_v50 = vmax.f32 %v530_v46, 0.0  ;;  %v615_v2 = vpop.permute.xlu0 %614  ;;  %v1696_v14 = vcvt.s32.f32 %v809_v3  ;;  %v816_v46 = vadd.s32 72, %v1688_v1  ;;  %vm844_vm8 = vcmp.lt.f32.partialorder %v1715_v42, 8.0 }
 0x1ed   :  { %v578_v51 = vpack.c.bf16 %v568_v48, %v567_v47  ;;  %1337 = vmatpush3.bf16.msra.mxu0 %v576_v35  ;;  %v627_v32 = vpop.permute.xlu1 %626  ;;  %v1706_v35 = vcvt.s32.f32 %v808_v8 }
 0x1ee   :  { %v577_v53 = vpack.c.bf16 %v566_v50, %v565_v49  ;;  %v1328_v54 = vpop.f32.mrb[12].mxu1  ;;  %vm841_vm1 = vcmp.lt.f32.partialorder %v1696_v14, 8.0  ;;  %v873_v50 = vld [vmem:[%s2228_s1 + $0x10] sm:$0xff] }
 0x1ef   :  { %v551_v55 = vadd.f32 %v1328_v54, %v406_v52  ;;  %v542_v56 = vpop.f32.mrb[13].mxu1  ;;  %vm840_vm4 = vcmp.lt.f32.partialorder %v1706_v35, 8.0  ;;  %v871_v54 = vld [vmem:[%s2228_s1] sm:$0xff] }
 0x1f0   :  { %v543_v58 = vadd.f32 %v542_v56, %v398_v40  ;;  %v1329_v59 = vpop.f32.mrb[14].mxu1  ;;  %1338 = vmatprep.subr.bf16.mxu0 %v577_v53  ;;  %v623_v27 = vpop.permute.xlu0 %622  ;;  %v1713_v40 = vcvt.s32.f32 %v814_v26  ;;  %v1744_v56 = vcvt.s32.f32 %v817_v43 }
 0x1f1   :  { %v554_v60 = vadd.f32 %v1329_v59, %v410_v57  ;;  %v545_v5 = vpop.f32.mrb[15].mxu1  ;;  %1339 = vmatpush3.bf16.msra.mxu0 %v577_v53  ;;  %v571_v9 = vmax.f32 %v551_v55, 0.0  ;;  %v1736_v52 = vpop.permute.xlu1 %634  ;;  %v1746_v57 = vcvt.s32.f32 %v815_v44  ;;  %v877_v59 = vld [vmem:[%s2228_s1 + $0x30] sm:$0xff] }
 0x1f2   :  { %v546_v6 = vadd.f32 %v545_v5, %v402_v45  ;;  %1340 = vmatprep.subr.bf16.mxu0 %v578_v51  ;;  %v569_v11 = vmax.f32 %v543_v58, 0.0  ;;  %v818_v45 = vadd.s32 88, %v1688_v1  ;;  %vm846_vm7 = vcmp.lt.f32.partialorder %v1713_v40, 8.0 }
 0x1f3   :  { %v572_v10 = vmax.f32 %v554_v60, 0.0  ;;  %vm849_vm9 = vcmp.lt.f32.partialorder %v1744_v56, 8.0  ;;  %vm847_vm10 = vcmp.lt.f32.partialorder %v1746_v57, 8.0 }
 0x1f4   :  { %v570_v12 = vmax.f32 %v546_v6, 0.0  ;;  %v1722_v47 = vpop.permute.xlu0 %630  ;;  %v1751_v5 = vcvt.s32.f32 %v818_v45  ;;  %v1753_v6 = vcvt.s32.f32 %v816_v46  ;;  %v881_v46 = vld [vmem:[%s2228_s1 + $0x50] sm:$0xff] }
 0x1f5   :  { %v580_v15 = vpack.c.bf16 %v572_v10, %v571_v9  ;;  %1341 = vmatpush3.bf16.msra.mxu0 %v578_v51  ;;  %v821_v9 = vadd.s32 112, %v1688_v1 }
 0x1f6   :  { %v579_v16 = vpack.c.bf16 %v570_v12, %v569_v11  ;;  %v874_v12 = vld [vmem:[%s2228_s1 + $0x18] sm:$0xff]  ;;  %vm850_vm11 = vcmp.lt.f32.partialorder %v1751_v5, 8.0  ;;  %vm848_vm12 = vcmp.lt.f32.partialorder %v1753_v6, 8.0 }
 0x1f8   :  { %1342 = vmatprep.subr.bf16.mxu0 %v579_v16 }
 0x1f9   :  { %1343 = vmatpush3.bf16.msra.mxu0 %v579_v16  ;;  %v875_v16 = vld [vmem:[%s2228_s1 + $0x20] sm:$0xff] }
 0x1fa   :  { %1344 = vmatprep.subr.bf16.mxu0 %v580_v15 }
 0x1fd   :  { %1345 = vmatpush3.bf16.msra.mxu0 %v580_v15 }
 0x200   :  { %1347 = vmatmul.mubr.bf16.vlgmr.msra.gmra.mrb[16].mxu0 %v1391_v17 }
 0x201   :  { %1350 = vmatprep.mubr.bf16.mxu0 %v1392_v18  ;;  %v819_v18 = vadd.s32 96, %v1688_v1 }
 0x208   :  { %1351 = vmatmul.mubr.bf16.gmra.mrb[20].mxu0 %v1393_v20 }
 0x209   :  { %1354 = vmatprep.mubr.bf16.mxu0 %v1394_v22 }
 0x210   :  { %1355 = vmatmul.mubr.bf16.gmra.mrb[24].mxu0 %v1395_v61 }
 0x211   :  { %1358 = vmatprep.mubr.bf16.mxu0 %v1396_v21 }
 0x218   :  { %1359 = vmatmul.mubr.bf16.gmra.mrb[28].mxu0 %v1397_v62  ;;  %v878_v62 = vld [vmem:[%s2228_s1 + $0x38] sm:$0xff] }
 0x2d3   :  { %v1348_v28 = vpop.f32.mrb[16].mxu0 }
 0x2d4   :  { %v743_v30 = vpop.f32.mrb[17].mxu0  ;;  %v752_v37 = vadd.f32 %v1348_v28, %v607_v63  ;;  %v639_v63 = vpop.permute.xlu0 %638 }
 0x2d5   :  { %v1349_v33 = vpop.f32.mrb[18].mxu0  ;;  %v744_v41 = vadd.f32 %v743_v30, %v599_v24 }
 0x2d6   :  { %v746_v38 = vpop.f32.mrb[19].mxu0  ;;  %v755_v48 = vadd.f32 %v1349_v33, %v611_v25  ;;  %v1729_v49 = vsel %vm841_vm1, %v752_v37, -1e+30 }
 0x2d7   :  { %v747_v51 = vadd.f32 %v746_v38, %v603_v0  ;;  %v1738_v53 = vsel %vm839_vm2, %v744_v41, -1e+30  ;;  %v1757_v10 = vadd.f32 %v873_v50, %v1729_v49  ;;  %v822_v50 = vadd.s32 120, %v1688_v1 }
 0x2d8   :  { %v1761_v11 = vsel %vm842_vm3, %v755_v48, -1e+30  ;;  %v1771_v20 = vadd.f32 %v871_v54, %v1738_v53 }
 0x2d9   :  { %v1775_v22 = vsel %vm840_vm4, %v747_v51, -1e+30  ;;  %v1801_v8 = vadd.f32 %v874_v12, %v1761_v11  ;;  %v647_v51 = vpop.permute.xlu0 %646 }
 0x2db   :  { %v1352_v55 = vpop.f32.mrb[20].mxu0 }
 0x2dc   :  { %v768_v58 = vadd.f32 %v1352_v55, %v623_v27  ;;  %v759_v60 = vpop.f32.mrb[21].mxu0  ;;  %v643_v27 = vpop.permute.xlu1 %642  ;;  %v879_v55 = vld [vmem:[%s2228_s1 + $0x40] sm:$0xff] }
 0x2dd   :  { %v760_v15 = vadd.f32 %v759_v60, %v615_v2  ;;  %v1353_v17 = vpop.f32.mrb[22].mxu0 }
 0x2de   :  { %v1779_v61 = vsel %vm845_vm5, %v768_v58, -1e+30  ;;  %v771_v21 = vadd.f32 %v1353_v17, %v627_v32  ;;  %v762_v24 = vpop.f32.mrb[23].mxu0  ;;  %v1824_v32 = vadd.f32 %v872_v23, %v1775_v22  ;;  %v820_v17 = vadd.s32 104, %v1688_v1  ;;  %v880_v23 = vld [vmem:[%s2228_s1 + $0x48] sm:$0xff] }
 0x2df   :  { %v1788_v0 = vadd.f32 %v877_v59, %v1779_v61  ;;  %v979_v25 = vmax.f32 %v1729_v49, %v1779_v61  ;;  %v1794_v2 = vsel %vm843_vm6, %v760_v15, -1e+30  ;;  %v763_v3 = vadd.f32 %v762_v24, %v1691_v4  ;;  %v882_v15 = vld [vmem:[%s2228_s1 + $0x58] sm:$0xff] }
 0x2e0   :  { %v1804_v13 = vadd.f32 %v875_v16, %v1794_v2  ;;  %v977_v19 = vmax.f32 %v1738_v53, %v1794_v2  ;;  %v1810_v26 = vsel %vm846_vm7, %v771_v21, -1e+30  ;;  %v1849_v59 = vcvt.s32.f32 %v821_v9  ;;  %v651_v21 = vpop.permute.xlu1 %650 }
 0x2e1   :  { %2246 = vst [vmem:[#allocation2_spill] sm:$0xff] %v1810_v26  ;;  %v905_v4 = vmax.f32 %v1757_v10, %v1788_v0  ;;  %v1815_v28 = vadd.f32 %v878_v62, %v1810_v26  ;;  %v980_v29 = vmax.f32 %v1761_v11, %v1810_v26  ;;  %v1821_v30 = vsel %vm844_vm8, %v763_v3, -1e+30 }
 0x2e2   :  { %v903_v33 = vmax.f32 %v1771_v20, %v1804_v13  ;;  %v1829_v37 = vadd.f32 %v876_v7, %v1821_v30  ;;  %v978_v38 = vmax.f32 %v1775_v22, %v1821_v30  ;;  %2247 = vst [vmem:[#allocation3_spill] sm:$0xff] %v1849_v59  ;;  %vm853_vm13 = vcmp.lt.f32.partialorder %v1849_v59, 8.0 }
 0x2e3   :  { %v906_v41 = vmax.f32 %v1801_v8, %v1815_v28  ;;  %v1356_v43 = vpop.f32.mrb[24].mxu0 }
 0x2e4   :  { %v904_v44 = vmax.f32 %v1824_v32, %v1829_v37  ;;  %v784_v45 = vadd.f32 %v1356_v43, %v639_v63  ;;  %v775_v48 = vpop.f32.mrb[25].mxu0 }
 0x2e5   :  { %v776_v54 = vadd.f32 %v775_v48, %v1722_v47  ;;  %v1357_v58 = vpop.f32.mrb[26].mxu0  ;;  %v1856_v47 = vcvt.s32.f32 %v819_v18  ;;  %v1895_v48 = vcvt.s32.f32 %v820_v17  ;;  %v886_v17 = vld [vmem:[%s2228_s1 + $0x78] sm:$0xff] }
 0x2e6   :  { %v1851_v60 = vsel %vm849_vm9, %v784_v45, -1e+30  ;;  %v787_v12 = vadd.f32 %v1357_v58, %v643_v27  ;;  %v778_v16 = vpop.f32.mrb[27].mxu0 }
 0x2e7   :  { %2248 = vst [vmem:[#allocation4_spill] sm:$0xff] %v1851_v60  ;;  %v1860_v62 = vadd.f32 %v881_v46, %v1851_v60  ;;  %v983_v24 = vmax.f32 %v979_v25, %v1851_v60  ;;  %v1865_v9 = vsel %vm847_vm10, %v776_v54, -1e+30  ;;  %v779_v63 = vadd.f32 %v778_v16, %v1736_v52  ;;  %2253 = vst [vmem:[#allocation9_spill] sm:$0xff] %v1895_v48 }
 0x2e8   :  { %2249 = vst [vmem:[#allocation5_spill] sm:$0xff] %v1865_v9  ;;  %v1872_v18 = vadd.f32 %v879_v55, %v1865_v9  ;;  %v981_v1 = vmax.f32 %v977_v19, %v1865_v9  ;;  %v1877_v3 = vsel %vm850_vm11, %v787_v12, -1e+30  ;;  %v1879_v25 = vcvt.s32.f32 %v822_v50  ;;  %v655_v50 = vpop.permute.xlu0 %654  ;;  %v659_v12 = vpop.permute.xlu1 %658 }
 0x2e9   :  { %2250 = vst [vmem:[#allocation6_spill] sm:$0xff] %v1877_v3  ;;  %v909_v7 = vmax.f32 %v905_v4, %v1860_v62  ;;  %v1883_v27 = vadd.f32 %v882_v15, %v1877_v3  ;;  %v984_v52 = vmax.f32 %v980_v29, %v1877_v3  ;;  %v1888_v43 = vsel %vm848_vm12, %v779_v63, -1e+30  ;;  %v883_v15 = vld [vmem:[%s2228_s1 + $0x60] sm:$0xff] }
 0x2ea   :  { %2251 = vst [vmem:[#allocation7_spill] sm:$0xff] %v1879_v25  ;;  %2252 = vst [vmem:[#allocation8_spill] sm:$0xff] %v1888_v43  ;;  %v907_v45 = vmax.f32 %v903_v33, %v1872_v18  ;;  %v1892_v19 = vadd.f32 %v880_v23, %v1888_v43  ;;  %v982_v46 = vmax.f32 %v978_v38, %v1888_v43  ;;  %v885_v33 = vld [vmem:[%s2228_s1 + $0x70] sm:$0xff]  ;;  %vm851_vm14 = vcmp.lt.f32.partialorder %v1856_v47, 8.0 }
 0x2eb   :  { %v910_v4 = vmax.f32 %v906_v41, %v1883_v27  ;;  %v1360_v54 = vpop.f32.mrb[28].mxu0  ;;  %vm854_vm15 = vcmp.lt.f32.partialorder %v1879_v25, 8.0  ;;  %vm852_vm0 = vcmp.lt.f32.partialorder %v1895_v48, 8.0 }
 0x2ec   :  { %v908_v29 = vmax.f32 %v904_v44, %v1892_v19  ;;  %v800_v55 = vadd.f32 %v1360_v54, %v655_v50  ;;  %v791_v58 = vpop.f32.mrb[29].mxu0 }
 0x2ed   :  { %v792_v38 = vadd.f32 %v791_v58, %v647_v51  ;;  %v1361_v41 = vpop.f32.mrb[30].mxu0 }
 0x2ee   :  { %v1908_v16 = vsel %vm853_vm13, %v800_v55, -1e+30  ;;  %v803_v44 = vadd.f32 %v1361_v41, %v659_v12  ;;  %v794_v63 = vpop.f32.mrb[31].mxu0  ;;  %v884_v55 = vld [vmem:[%s2228_s1 + $0x68] sm:$0xff] }
 0x2ef   :  { %2254 = vst [vmem:[#allocation10_spill] sm:$0xff] %v1908_v16  ;;  %v1915_v23 = vadd.f32 %v885_v33, %v1908_v16  ;;  %v987_v51 = vmax.f32 %v983_v24, %v1908_v16  ;;  %v1918_v50 = vsel %vm851_vm14, %v792_v38, -1e+30  ;;  %v795_v54 = vadd.f32 %v794_v63, %v651_v21 }
 0x2f0   :  { %2255 = vst [vmem:[#allocation11_spill] sm:$0xff] %v1918_v50  ;;  %v1924_v58 = vadd.f32 %v883_v15, %v1918_v50  ;;  %v985_v12 = vmax.f32 %v981_v1, %v1918_v50  ;;  %v1927_v41 = vsel %vm854_vm15, %v803_v44, -1e+30 }
 0x2f1   :  { %2256 = vst [vmem:[#allocation12_spill] sm:$0xff] %v1927_v41  ;;  %v913_v3 = vmax.f32 %v909_v7, %v1915_v23  ;;  %v1931_v33 = vadd.f32 %v886_v17, %v1927_v41  ;;  %v988_v24 = vmax.f32 %v984_v52, %v1927_v41  ;;  %v1934_v38 = vsel %vm852_vm0, %v795_v54, -1e+30 }
 0x2f2   :  { %2257 = vst [vmem:[#allocation13_spill] sm:$0xff] %v1934_v38  ;;  %v911_v21 = vmax.f32 %v907_v45, %v1924_v58  ;;  %v900_v63 = vadd.f32 %v884_v55, %v1934_v38  ;;  %v986_v15 = vmax.f32 %v982_v46, %v1934_v38 }
 0x2f3   :  { %v914_v16 = vmax.f32 %v910_v4, %v1931_v33  ;;  %v990_v1 = vmax.f32 %v987_v51, %v988_v24  ;;  %v2261_v51 = vld [vmem:[#allocation2_spill] sm:$0xff] }
 0x2f4   :  { %v912_v44 = vmax.f32 %v908_v29, %v900_v63  ;;  %v989_v50 = vmax.f32 %v985_v12, %v986_v15 }
 0x2f5   :  { %v916_v60 = vmax.f32 %v913_v3, %v914_v16 }
 0x2f6   :  { %v915_v7 = vmax.f32 %v911_v21, %v912_v44  ;;  %v991_v43 = vmax.f32 %v989_v50, %v990_v1  ;;  %v2264_v21 = vld [vmem:[#allocation4_spill] sm:$0xff]  ;;  %v2265_v1 = vld [vmem:[#allocation6_spill] sm:$0xff] }
 0x2f8   :  { %v917_v17 = vmax.f32 %v915_v7, %v916_v60  ;;  %v992_v9 = vrot.slane %v991_v43, 4  ;;  %v2266_v7 = vld [vmem:[#allocation11_spill] sm:$0xff] }
 0x2fa   :  { %v918_v26 = vrot.slane %v917_v17, 4  ;;  %v993_v52 = vmax.f32 %v991_v43, %v992_v9 }
 0x2fc   :  { %v919_v54 = vmax.f32 %v917_v17, %v918_v26  ;;  %v994_v41 = vrot.slane %v993_v52, 2 }
 0x2fe   :  { %v920_v25 = vrot.slane %v919_v54, 2  ;;  %v995_v45 = vmax.f32 %v993_v52, %v994_v41  ;;  %v2263_v41 = vld [vmem:[#allocation8_spill] sm:$0xff]  ;;  %v2267_v52 = vld [vmem:[#allocation13_spill] sm:$0xff] }
 0x300   :  { %v921_v59 = vmax.f32 %v919_v54, %v920_v25  ;;  %v996_v55 = vrot.slane %v995_v45, 1 }
 0x302   :  { %v922_v48 = vrot.slane %v921_v59, 1  ;;  %v997_v46 = vmax.f32 %v995_v45, %v996_v55  ;;  %v2268_v45 = vld [vmem:[#allocation10_spill] sm:$0xff] }
 0x304   :  { %v923_v38 = vmax.f32 %v921_v59, %v922_v48  ;;  %v1941_v4 = vsub.f32 %v1738_v53, %v997_v46  ;;  %v1944_v3 = vsub.f32 %v1775_v22, %v997_v46  ;;  %v1947_v60 = vsub.f32 %v1729_v49, %v997_v46 }
 0x305   :  { %v1950_v9 = vsub.f32 %v1761_v11, %v997_v46  ;;  %v1953_v26 = vsub.f32 %v1794_v2, %v997_v46  ;;  %v1956_v25 = vsub.f32 %v1821_v30, %v997_v46  ;;  %v1959_v59 = vsub.f32 %v1779_v61, %v997_v46 }
 0x306   :  { %vm924_vm1 = vcmp.ge.f32.partialorder %v1771_v20, %v923_v38  ;;  %vm925_vm2 = vcmp.ge.f32.partialorder %v1824_v32, %v923_v38  ;;  %vm926_vm3 = vcmp.ge.f32.partialorder %v1757_v10, %v923_v38  ;;  %vm927_vm4 = vcmp.ge.f32.partialorder %v1801_v8, %v923_v38  ;;  %v2258_v32 = vld [vmem:[#allocation9_spill] sm:$0xff] }
 0x307   :  { %vm928_vm5 = vcmp.ge.f32.partialorder %v1804_v13, %v923_v38  ;;  %vm929_vm6 = vcmp.ge.f32.partialorder %v1829_v37, %v923_v38  ;;  %vm930_vm7 = vcmp.ge.f32.partialorder %v1788_v0, %v923_v38  ;;  %vm931_vm8 = vcmp.ge.f32.partialorder %v1815_v28, %v923_v38 }
 0x308   :  { %vm932_vm9 = vcmp.ge.f32.partialorder %v1872_v18, %v923_v38  ;;  %vm933_vm10 = vcmp.ge.f32.partialorder %v1892_v19, %v923_v38  ;;  %vm934_vm11 = vcmp.ge.f32.partialorder %v1860_v62, %v923_v38  ;;  %vm935_vm12 = vcmp.ge.f32.partialorder %v1883_v27, %v923_v38  ;;  %v2259_v18 = vld [vmem:[#allocation3_spill] sm:$0xff] }
 0x309   :  { %vm936_vm13 = vcmp.ge.f32.partialorder %v1924_v58, %v923_v38  ;;  %vm937_vm14 = vcmp.ge.f32.partialorder %v900_v63, %v923_v38  ;;  %vm938_vm15 = vcmp.ge.f32.partialorder %v1915_v23, %v923_v38  ;;  %vm939_vm0 = vcmp.ge.f32.partialorder %v1931_v33, %v923_v38  ;;  %v2260_v19 = vld [vmem:[#allocation7_spill] sm:$0xff]  ;;  %v2262_v58 = vld [vmem:[#allocation5_spill] sm:$0xff] }
 0x30a   :  { %v940_v49 = vsel %vm924_vm1, %v1702_v31, 128.0  ;;  %v941_v53 = vsel %vm925_vm2, %v1706_v35, 128.0  ;;  %v942_v11 = vsel %vm926_vm3, %v1696_v14, 128.0  ;;  %v943_v22 = vsel %vm927_vm4, %v1704_v34, 128.0 }
 0x30b   :  { %v944_v61 = vsel %vm928_vm5, %v1711_v39, 128.0  ;;  %v945_v20 = vsel %vm929_vm6, %v1715_v42, 128.0  ;;  %v946_v2 = vsel %vm930_vm7, %v1708_v36, 128.0  ;;  %v947_v10 = vsel %vm931_vm8, %v1713_v40, 128.0 }
 0x30c   :  { %v948_v8 = vsel %vm932_vm9, %v1746_v57, 128.0  ;;  %v949_v13 = vsel %vm933_vm10, %v1753_v6, 128.0  ;;  %v950_v30 = vsel %vm934_vm11, %v1744_v56, 128.0  ;;  %v951_v0 = vsel %vm935_vm12, %v1751_v5, 128.0 }
 0x30d   :  { %v952_v28 = vsel %vm936_vm13, %v1856_v47, 128.0  ;;  %v953_v37 = vsel %vm937_vm14, %v2258_v32, 128.0  ;;  %v954_v43 = vsel %vm938_vm15, %v2259_v18, 128.0  ;;  %v955_v62 = vsel %vm939_vm0, %v2260_v19, 128.0 }
 0x30e   :  { %v956_v48 = vmin.f32 %v940_v49, %v944_v61  ;;  %v957_v29 = vmin.f32 %v941_v53, %v945_v20  ;;  %v958_v16 = vmin.f32 %v942_v11, %v946_v2  ;;  %v959_v27 = vmin.f32 %v943_v22, %v947_v10  ;;  %v2269_v61 = vld [vmem:[#allocation12_spill] sm:$0xff] }
 0x30f   :  { %v2024_v50 = vsub.f32 %v2261_v51, %v997_v46  ;;  %v2027_v12 = vsub.f32 %v2262_v58, %v997_v46  ;;  %v2030_v24 = vsub.f32 %v2263_v41, %v997_v46  ;;  %v2033_v23 = vsub.f32 %v2264_v21, %v997_v46 }
 0x310   :  { %v960_v63 = vmin.f32 %v956_v48, %v948_v8  ;;  %v961_v15 = vmin.f32 %v957_v29, %v949_v13  ;;  %v962_v33 = vmin.f32 %v958_v16, %v950_v30  ;;  %v963_v38 = vmin.f32 %v959_v27, %v951_v0 }
 0x311   :  { %v2036_v44 = vsub.f32 %v2265_v1, %v997_v46  ;;  %v2039_v17 = vsub.f32 %v2266_v7, %v997_v46  ;;  %v2042_v54 = vsub.f32 %v2267_v52, %v997_v46  ;;  %v2045_v55 = vsub.f32 %v2268_v45, %v997_v46 }
 0x312   :  { %v964_v49 = vmin.f32 %v960_v63, %v952_v28  ;;  %v965_v53 = vmin.f32 %v961_v15, %v953_v37  ;;  %v966_v11 = vmin.f32 %v962_v33, %v954_v43  ;;  %v967_v22 = vmin.f32 %v963_v38, %v955_v62 }
 0x313   :  { %v2048_v20 = vsub.f32 %v2269_v61, %v997_v46  ;;  %v1014_v2 = vmul.f32 1.442695, %v1941_v4  ;;  %v1016_v10 = vmul.f32 1.442695, %v1944_v3  ;;  %v1018_v30 = vmul.f32 1.442695, %v1947_v60 }
 0x314   :  { %v968_v8 = vmin.f32 %v964_v49, %v965_v53  ;;  %v969_v13 = vmin.f32 %v966_v11, %v967_v22  ;;  %v1020_v48 = vmul.f32 1.442695, %v1950_v9  ;;  %v1022_v37 = vmul.f32 1.442695, %v1953_v26 }
 0x315   :  { %1398 = vpow2.f32 %v1014_v2  ;;  %v1024_v46 = vmul.f32 1.442695, %v1956_v25  ;;  %v1026_v29 = vmul.f32 1.442695, %v1959_v59  ;;  %v1028_v27 = vmul.f32 1.442695, %v2024_v50 }
 0x316   :  { %v970_v0 = vmin.f32 %v968_v8, %v969_v13  ;;  %1400 = vpow2.f32 %v1016_v10  ;;  %v1030_v21 = vmul.f32 1.442695, %v2027_v12  ;;  %v1032_v33 = vmul.f32 1.442695, %v2030_v24 }
 0x317   :  { %1402 = vpow2.f32 %v1018_v30  ;;  %v1034_v52 = vmul.f32 1.442695, %v2033_v23  ;;  %v1036_v53 = vmul.f32 1.442695, %v2036_v44  ;;  %v1038_v61 = vmul.f32 1.442695, %v2039_v17 }
 0x318   :  { %v971_v28 = vrot.slane %v970_v0, 4  ;;  %1404 = vpow2.f32 %v1020_v48  ;;  %v1040_v13 = vmul.f32 1.442695, %v2042_v54 }
 0x319   :  { %1406 = vpow2.f32 %v1022_v37 }
 0x31a   :  { %v972_v43 = vmin.f32 %v970_v0, %v971_v28  ;;  %1408 = vpow2.f32 %v1024_v46  ;;  %v1042_v28 = vmul.f32 1.442695, %v2045_v55  ;;  %v1044_v46 = vmul.f32 1.442695, %v2048_v20 }
 0x31b   :  { %1410 = vpow2.f32 %v1026_v29 }
 0x31c   :  { %v973_v62 = vrot.slane %v972_v43, 2  ;;  %1412 = vpow2.f32 %v1028_v27 }
 0x31d   :  { %1414 = vpow2.f32 %v1030_v21 }
 0x31e   :  { %v974_v16 = vmin.f32 %v972_v43, %v973_v62  ;;  %1416 = vpow2.f32 %v1032_v33 }
 0x31f   :  { %v2058_v51 = vpop.eup %1398  ;;  %1418 = vpow2.f32 %v1034_v52 }
 0x320   :  { %v2060_v58 = vpop.eup %1400  ;;  %v975_v41 = vrot.slane %v974_v16, 1  ;;  %1420 = vpow2.f32 %v1036_v53 }
 0x321   :  { %v1046_v63 = vadd.f32 %v2060_v58, %v2058_v51  ;;  %v2065_v15 = vpop.eup %1402  ;;  %1422 = vpow2.f32 %v1038_v61 }
 0x322   :  { %v2069_v1 = vpop.eup %1404  ;;  %v2071_v7 = vmin.f32 %v974_v16, %v975_v41  ;;  %1424 = vpow2.f32 %v1040_v13 }
 0x323   :  { %v1047_v38 = vadd.f32 %v2065_v15, %v1046_v63  ;;  %v2075_v49 = vpop.eup %1406  ;;  %1426 = vpow2.f32 %v1042_v28 }
 0x324   :  { %v2079_v22 = vpop.eup %1408  ;;  %v1362_v2 = vtrunc.f32 %v2071_v7  ;;  %1428 = vpow2.f32 %v1044_v46  ;;  %vm1140_vm1 = vcmp.eq.f32.partialorder %v1702_v31, %v2071_v7  ;;  %vm1141_vm2 = vcmp.eq.f32.partialorder %v1706_v35, %v2071_v7 }
 0x325   :  { %v1048_v45 = vadd.f32 %v2069_v1, %v1047_v38  ;;  %v2084_v8 = vpop.eup %1410  ;;  %vm1142_vm3 = vcmp.eq.f32.partialorder %v1696_v14, %v2071_v7  ;;  %vm1143_vm4 = vcmp.eq.f32.partialorder %v1704_v34, %v2071_v7  ;;  %vm1144_vm5 = vcmp.eq.f32.partialorder %v1711_v39, %v2071_v7 }
 0x326   :  { %v1363_v30 = vcvt.f32.s32 %v1362_v2  ;;  %v2088_v48 = vpop.eup %1412  ;;  %vm1145_vm6 = vcmp.eq.f32.partialorder %v1715_v42, %v2071_v7  ;;  %vm1146_vm7 = vcmp.eq.f32.partialorder %v1708_v36, %v2071_v7  ;;  %vm1147_vm8 = vcmp.eq.f32.partialorder %v1713_v40, %v2071_v7 }
 0x327   :  { %v1049_v11 = vadd.f32 %v2075_v49, %v1048_v45  ;;  %v2095_v43 = vpop.eup %1414  ;;  %vm1148_vm9 = vcmp.eq.f32.partialorder %v1746_v57, %v2071_v7  ;;  %vm1149_vm10 = vcmp.eq.f32.partialorder %v1753_v6, %v2071_v7  ;;  %vm1150_vm11 = vcmp.eq.f32.partialorder %v1744_v56, %v2071_v7 }
 0x328   :  { %1194 = vst [vmem:[%s2229_s6] sm:$0x1] %v1363_v30  ;;  %v2099_v29 = vpop.eup %1416  ;;  %vm1151_vm12 = vcmp.eq.f32.partialorder %v1751_v5, %v2071_v7  ;;  %vm1152_vm13 = vcmp.eq.f32.partialorder %v1856_v47, %v2071_v7  ;;  %vm1153_vm14 = vcmp.eq.f32.partialorder %v2258_v32, %v2071_v7  ;;  %vm1154_vm15 = vcmp.eq.f32.partialorder %v2259_v18, %v2071_v7 }
 0x329   :  { %v1050_v10 = vadd.f32 %v2079_v22, %v1049_v11  ;;  %v2102_v27 = vpop.eup %1418  ;;  %vm1155_vm0 = vcmp.eq.f32.partialorder %v2260_v19, %v2071_v7 }
 0x32a   :  { %v2105_v21 = vpop.eup %1420 }
 0x32b   :  { %v1051_v0 = vadd.f32 %v2084_v8, %v1050_v10  ;;  %v2108_v33 = vpop.eup %1422 }
 0x32c   :  { %v2111_v52 = vpop.eup %1424 }
 0x32d   :  { %v1052_v37 = vadd.f32 %v2088_v48, %v1051_v0  ;;  %v2114_v53 = vpop.eup %1426 }
 0x32e   :  { %v2117_v61 = vpop.eup %1428 }
 0x32f   :  { %v1053_v62 = vadd.f32 %v2095_v43, %v1052_v37 }
 0x331   :  { %v1054_v16 = vadd.f32 %v2099_v29, %v1053_v62 }
 0x333   :  { %v1055_v41 = vadd.f32 %v2102_v27, %v1054_v16 }
 0x335   :  { %v1056_v63 = vadd.f32 %v2105_v21, %v1055_v41 }
 0x337   :  { %v1057_v38 = vadd.f32 %v2108_v33, %v1056_v63 }
 0x339   :  { %v1058_v45 = vadd.f32 %v2111_v52, %v1057_v38 }
 0x33b   :  { %v1059_v11 = vadd.f32 %v2114_v53, %v1058_v45 }
 0x33d   :  { %v1060_v2 = vadd.f32 %v2117_v61, %v1059_v11 }
 0x33f   :  { %v1061_v10 = vrot.slane %v1060_v2, 4 }
 0x341   :  { %v1062_v13 = vadd.f32 %v1061_v10, %v1060_v2 }
 0x343   :  { %v1063_v30 = vrot.slane %v1062_v13, 2 }
 0x345   :  { %v1064_v0 = vadd.f32 %v1063_v30, %v1062_v13 }
 0x347   :  { %v1065_v28 = vrot.slane %v1064_v0, 1 }
 0x349   :  { %v1066_v37 = vadd.f32 %v1065_v28, %v1064_v0 }
 0x34b   :  { %1430 = vlog2.f32 %v1066_v37 }
 0x34c   :  { %1432 = vrcp.f32 %v1066_v37 }
 0x355   :  { %v1431_v46 = vpop.eup %1430 }
 0x356   :  { %v2120_v62 = vmul.f32 0.6931472, %v1431_v46  ;;  %v2122_v16 = vpop.eup %1432 }
 0x357   :  { %v1086_v38 = vmul.f32 %v2122_v16, %v2058_v51  ;;  %v1087_v45 = vmul.f32 %v2122_v16, %v2060_v58 }
 0x358   :  { %v1069_v41 = vsub.f32 %v1941_v4, %v2120_v62  ;;  %v1070_v63 = vsub.f32 %v1944_v3, %v2120_v62  ;;  %v1071_v11 = vsub.f32 %v1947_v60, %v2120_v62  ;;  %v1072_v13 = vsub.f32 %v1950_v9, %v2120_v62 }
 0x359   :  { %v1088_v4 = vmul.f32 %v2122_v16, %v2065_v15  ;;  %v1073_v3 = vsub.f32 %v1953_v26, %v2120_v62  ;;  %v1089_v60 = vmul.f32 %v2122_v16, %v2069_v1  ;;  %v1074_v9 = vsub.f32 %v1956_v25, %v2120_v62 }
 0x35a   :  { %v1102_v2 = vmul.f32 %v1086_v38, %v1069_v41  ;;  %v1103_v10 = vmul.f32 %v1087_v45, %v1070_v63  ;;  %v1156_v30 = vsel %vm1140_vm1, %v1069_v41, 0.0  ;;  %v1157_v0 = vsel %vm1141_vm2, %v1070_v63, 0.0 }
 0x35b   :  { %v1104_v51 = vmul.f32 %v1088_v4, %v1071_v11  ;;  %v1090_v15 = vmul.f32 %v2122_v16, %v2075_v49  ;;  %v1105_v31 = vmul.f32 %v1089_v60, %v1072_v13  ;;  %v1075_v35 = vsub.f32 %v1959_v59, %v2120_v62 }
 0x35c   :  { %v1118_v58 = vadd.f32 %v1103_v10, %v1102_v2  ;;  %v1091_v26 = vmul.f32 %v2122_v16, %v2079_v22  ;;  %v1172_v46 = vadd.f32 %v1157_v0, %v1156_v30  ;;  %v1076_v25 = vsub.f32 %v2024_v50, %v2120_v62 }
 0x35d   :  { %v1106_v1 = vmul.f32 %v1090_v15, %v1073_v3  ;;  %v1158_v49 = vsel %vm1142_vm3, %v1071_v11, 0.0  ;;  %v1092_v41 = vmul.f32 %v2122_v16, %v2084_v8  ;;  %v1077_v14 = vsub.f32 %v2027_v12, %v2120_v62 }
 0x35e   :  { %v1119_v28 = vadd.f32 %v1118_v58, %v1104_v51  ;;  %v1107_v59 = vmul.f32 %v1091_v26, %v1074_v9  ;;  %v1173_v38 = vadd.f32 %v1172_v46, %v1158_v49  ;;  %v1159_v22 = vsel %vm1143_vm4, %v1072_v13, 0.0 }
 0x35f   :  { %v1093_v50 = vmul.f32 %v2122_v16, %v2088_v48  ;;  %v1108_v45 = vmul.f32 %v1092_v41, %v1075_v35  ;;  %v1078_v11 = vsub.f32 %v2030_v24, %v2120_v62  ;;  %v1160_v8 = vsel %vm1144_vm5, %v1073_v3, 0.0 }
 0x360   :  { %v1120_v37 = vadd.f32 %v1119_v28, %v1105_v31  ;;  %v1174_v34 = vadd.f32 %v1173_v38, %v1159_v22  ;;  %v1094_v12 = vmul.f32 %v2122_v16, %v2095_v43  ;;  %v1079_v13 = vsub.f32 %v2033_v23, %v2120_v62 }
 0x361   :  { %v1109_v10 = vmul.f32 %v1093_v50, %v1076_v25  ;;  %v1161_v48 = vsel %vm1145_vm6, %v1074_v9, 0.0  ;;  %v1095_v24 = vmul.f32 %v2122_v16, %v2099_v29  ;;  %v1080_v3 = vsub.f32 %v2036_v44, %v2120_v62 }
 0x362   :  { %v1121_v63 = vadd.f32 %v1120_v37, %v1106_v1  ;;  %v1175_v39 = vadd.f32 %v1174_v34, %v1160_v8  ;;  %v1110_v60 = vmul.f32 %v1094_v12, %v1077_v14  ;;  %v1162_v43 = vsel %vm1146_vm7, %v1075_v35, 0.0 }
 0x363   :  { %v1096_v23 = vmul.f32 %v2122_v16, %v2102_v27  ;;  %v1111_v58 = vmul.f32 %v1095_v24, %v1078_v11  ;;  %v1081_v0 = vsub.f32 %v2039_v17, %v2120_v62  ;;  %v1163_v29 = vsel %vm1147_vm8, %v1076_v25, 0.0 }
 0x364   :  { %v1122_v2 = vadd.f32 %v1121_v63, %v1107_v59  ;;  %v1176_v42 = vadd.f32 %v1175_v39, %v1161_v48  ;;  %v1097_v44 = vmul.f32 %v2122_v16, %v2105_v21  ;;  %v1082_v31 = vsub.f32 %v2042_v54, %v2120_v62 }
 0x365   :  { %v1112_v9 = vmul.f32 %v1096_v23, %v1079_v13  ;;  %v1164_v27 = vsel %vm1148_vm9, %v1077_v14, 0.0  ;;  %v1098_v17 = vmul.f32 %v2122_v16, %v2108_v33  ;;  %v1083_v26 = vsub.f32 %v2045_v55, %v2120_v62 }
 0x366   :  { %v1123_v4 = vadd.f32 %v1122_v2, %v1108_v45  ;;  %v1177_v36 = vadd.f32 %v1176_v42, %v1162_v43  ;;  %v1113_v28 = vmul.f32 %v1097_v44, %v1080_v3  ;;  %v1165_v21 = vsel %vm1149_vm10, %v1078_v11, 0.0 }
 0x367   :  { %v1099_v54 = vmul.f32 %v2122_v16, %v2111_v52  ;;  %v1114_v1 = vmul.f32 %v1098_v17, %v1081_v0  ;;  %v1084_v46 = vsub.f32 %v2048_v20, %v2120_v62  ;;  %v1166_v33 = vsel %vm1150_vm11, %v1079_v13, 0.0 }
 0x368   :  { %v1124_v51 = vadd.f32 %v1123_v4, %v1109_v10  ;;  %v1178_v40 = vadd.f32 %v1177_v36, %v1163_v29  ;;  %v1100_v55 = vmul.f32 %v2122_v16, %v2114_v53  ;;  %v1167_v52 = vsel %vm1151_vm12, %v1080_v3, 0.0 }
 0x369   :  { %v1115_v25 = vmul.f32 %v1099_v54, %v1082_v31  ;;  %v1101_v41 = vmul.f32 %v2122_v16, %v2117_v61  ;;  %v1168_v62 = vsel %vm1152_vm13, %v1081_v0, 0.0  ;;  %v1169_v14 = vsel %vm1153_vm14, %v1082_v31, 0.0 }
 0x36a   :  { %v1125_v30 = vadd.f32 %v1124_v51, %v1110_v60  ;;  %v1179_v57 = vadd.f32 %v1178_v40, %v1164_v27  ;;  %v1116_v59 = vmul.f32 %v1100_v55, %v1083_v26  ;;  %v1170_v50 = vsel %vm1154_vm15, %v1083_v26, 0.0 }
 0x36b   :  { %v1117_v38 = vmul.f32 %v1101_v41, %v1084_v46  ;;  %v1171_v16 = vsel %vm1155_vm0, %v1084_v46, 0.0  ;;  %vm1195_vm1 = vcmask 1040384  }
 0x36c   :  { %v1126_v15 = vadd.f32 %v1125_v30, %v1111_v58  ;;  %v1180_v6 = vadd.f32 %v1179_v57, %v1165_v21 }
 0x36e   :  { %v1127_v35 = vadd.f32 %v1126_v15, %v1112_v9  ;;  %v1181_v56 = vadd.f32 %v1180_v6, %v1166_v33 }
 0x370   :  { %v1128_v37 = vadd.f32 %v1127_v35, %v1113_v28  ;;  %v1182_v20 = vadd.f32 %v1181_v56, %v1167_v52 }
 0x372   :  { %v1129_v49 = vadd.f32 %v1128_v37, %v1114_v1  ;;  %v1183_v53 = vadd.f32 %v1182_v20, %v1168_v62 }
 0x374   :  { %v1130_v63 = vadd.f32 %v1129_v49, %v1115_v25  ;;  %v1184_v47 = vadd.f32 %v1183_v53, %v1169_v14 }
 0x376   :  { %v1131_v5 = vadd.f32 %v1130_v63, %v1116_v59  ;;  %v1185_v61 = vadd.f32 %v1184_v47, %v1170_v50 }
 0x378   :  { %v1132_v22 = vadd.f32 %v1131_v5, %v1117_v38  ;;  %v1186_v34 = vadd.f32 %v1185_v61, %v1171_v16 }
 0x37a   :  { %v1133_v45 = vrot.slane %v1132_v22, 4  ;;  %v1187_v8 = vrot.slane %v1186_v34, 4 }
 0x37c   :  { %v1134_v2 = vadd.f32 %v1133_v45, %v1132_v22  ;;  %v1188_v32 = vadd.f32 %v1187_v8, %v1186_v34 }
 0x37e   :  { %v1135_v11 = vrot.slane %v1134_v2, 2  ;;  %v1189_v4 = vrot.slane %v1188_v32, 2 }
 0x380   :  { %v1136_v12 = vadd.f32 %v1135_v11, %v1134_v2  ;;  %v1190_v13 = vadd.f32 %v1189_v4, %v1188_v32 }
 0x382   :  { %v1137_v10 = vrot.slane %v1136_v12, 1  ;;  %v1191_v18 = vrot.slane %v1190_v13, 1 }
 0x384   :  { %v1138_v39 = vadd.f32 %v1137_v10, %v1136_v12  ;;  %v1192_v24 = vadd.f32 %v1191_v18, %v1190_v13 }
 0x386   :  { %v1139_v48 = vsub.f32 0.0, %v1138_v39 }
 0x388   :  { %v1196_v60 = vsel %vm1195_vm1, %v1192_v24, %v1139_v48 }
 0x389   :  { %1197 = vst [vmem:[%s2230_s7] sm:$0x3] %v1196_v60 }

</bundles_post_ra>
